<compile_context>
chip_gen: v5e
topology: v5e:2x2
jax: 0.10.0
libtpu: 0.0.40
codegen_flags: <defaults>
</compile_context>

<pallas_src>
import functools

import jax
import jax.numpy as jnp
from jax.experimental import pallas as pl
from jax.experimental.pallas import tpu as pltpu

_VOCAB_TILE_CAP = 4096          # max vocab tile width (multiple of 128)


def _cdiv(a, b):
    return (a + b - 1) // b


def _round_up(x, m):
    return ((x + m - 1) // m) * m


def _pick_sub_rows(tile_rows):
    # Largest row sub-chunk (<= 64) that divides tile_rows; keeps the running
    # partial vreg-resident.
    for s in (64, 32, 16, 8):
        if tile_rows % s == 0:
            return s
    return tile_rows


def _vmem_capacity_bytes():
    # Trace-time hardware query; fall back to the smallest generation (v7x
    # per-TensorCore VMEM) if unavailable.
    try:
        return int(pltpu.get_tpu_info().vmem_capacity_bytes)
    except Exception:  # pragma: no cover - conservative fallback
        return 64 << 20


def _lm_criterion_kernel(inp_ref, tgt_ref, mask_ref, out_ref, acc_ref, *,
                         tile_rows, tile_v, sub_rows):
    j = pl.program_id(1)                                   # vocab-tile index

    @pl.when(j == 0)
    def _init():
        acc_ref[...] = jnp.zeros_like(acc_ref)

    in_dtype = inp_ref.dtype
    zero = jnp.zeros((), in_dtype)
    n_sub = tile_rows // sub_rows

    if tile_v % 128 == 0:
        # ---- fused lane-group gather (the fast path) -----------------------
        n_groups = tile_v // 128
        # Hoisted once per grid step, reused by every sub-chunk / group.
        lane = jax.lax.broadcasted_iota(jnp.int32, (sub_rows, 128), 1)
        base = j * tile_v

        @pl.loop(0, n_sub)
        def _row_chunk(s):
            r0 = pl.multiple_of(s * sub_rows, sub_rows)
            tgt_local = tgt_ref[pl.ds(r0, sub_rows), :] - base   # (SR, 1) i32
            partial = jnp.zeros((sub_rows, 128), in_dtype)        # vreg-resident
            for g in range(n_groups):                             # unrolled
                x = inp_ref[pl.ds(r0, sub_rows), pl.ds(g * 128, 128)]
                hit = lane == (tgt_local - g * 128)
                partial = partial + jnp.where(hit, x, zero)
            # Exactly one lane per row ever nonzero -> bf16 adds are exact;
            # upcast only the per-sub-chunk partial.
            acc_ref[pl.ds(r0, sub_rows), :] += partial.astype(jnp.float32)
    else:
        # ---- small / irregular vocab (single V tile) -----------------------
        col = jax.lax.broadcasted_iota(jnp.int32, (sub_rows, tile_v), 1)

        @pl.loop(0, n_sub)
        def _row_chunk(s):
            r0 = pl.multiple_of(s * sub_rows, sub_rows)
            x = inp_ref[pl.ds(r0, sub_rows), :].astype(jnp.float32)
            tgt_local = tgt_ref[pl.ds(r0, sub_rows), :]
            sel = jnp.where(col == tgt_local, x, 0.0)
            acc_ref[pl.ds(r0, sub_rows), :] += jnp.sum(sel, axis=1,
                                                       keepdims=True)

    @pl.when(j == pl.num_programs(1) - 1)
    def _epilogue():
        m = mask_ref[...]                                   # (TR, 1) f32
        # where-guard: padded / out-of-bounds rows (mask == 0) can never
        # inject garbage / NaN / Inf into the sum.
        weighted = jnp.where(m != 0.0, acc_ref[...] * (-m), 0.0)
        out_ref[0] = jnp.sum(weighted, axis=0, keepdims=True)   # lane-dense


@functools.partial(jax.jit, static_argnames=("tile_rows", "tile_v"))
def language_model_criterion(inp, target, mask, *, tile_rows=None, tile_v=None):
    """inp: (B, T, V) log-probs (f32 or bf16); target: (B, T'); mask: (B, T').

    Returns sum(-inp[b, t, target[b, t]] * mask[b, t]) / sum(mask).
    """
    B, T, V = inp.shape
    target = target[:, :T].astype(jnp.int32)
    mask = mask[:, :T].astype(jnp.float32)

    N = B * T
    inp_f = inp.reshape(N, V)                    # free reshape, native dtype
    itemsize = jnp.dtype(inp_f.dtype).itemsize

    # ---- per-generation budgets -------------------------------------------
    vmem_cap = _vmem_capacity_bytes()
    big_vmem = vmem_cap >= (96 << 20)            # v5e / v6e (128 MiB) vs v7x (64 MiB)
    block_budget = (12 << 20) if big_vmem else (5 << 20)
    vmem_limit_cap = (96 << 20) if big_vmem else (48 << 20)

    # ---- tile selection ----------------------------------------------------
    if tile_v is None:
        tile_v = V if V <= _VOCAB_TILE_CAP else _VOCAB_TILE_CAP
    tile_v = int(tile_v)
    assert tile_v % 128 == 0 or tile_v == V, "tile_v must be a multiple of 128 or V"

    if tile_rows is None:
        tr = block_budget // max(1, tile_v * itemsize)
        tr = max(8, min(2048, tr))
        tr = (tr // 64) * 64 if tr >= 64 else (tr // 8) * 8
        # Keep >= 2 row blocks whenever there are enough rows, so both v7x
        # TensorCores get work on the "parallel" axis (harmless on 1-TC chips).
        if N >= 16:
            tr = min(tr, _round_up(_cdiv(N, 2), 8))
        tile_rows = min(tr, _round_up(N, 8))
    tile_rows = int(tile_rows)
    assert tile_rows % 8 == 0, "tile_rows must be a multiple of 8"

    sub_rows = _pick_sub_rows(tile_rows)
    nr = _cdiv(N, tile_rows)
    nv = _cdiv(V, tile_v)
    acc_w = 128 if tile_v % 128 == 0 else 1

    # Pad only the tiny (N, 1) side arrays; padded rows get mask == 0 and are
    # masked out inside the kernel, so the big (N, V) tensor is never copied.
    n_pad = nr * tile_rows - N
    tgt_f = target.reshape(N, 1)
    msk_f = mask.reshape(N, 1)
    if n_pad:
        tgt_f = jnp.pad(tgt_f, ((0, n_pad), (0, 0)))
        msk_f = jnp.pad(msk_f, ((0, n_pad), (0, 0)))

    # Honest VMEM estimate: fused kernel temporaries are O(sub_rows * 128),
    # covered by the headroom term.
    need = (2 * tile_rows * tile_v * itemsize          # input double buffer
            + 2 * 2 * tile_rows * 4                    # tgt / mask double buffers
            + tile_rows * acc_w * 4                    # accumulator scratch
            + (2 << 20))                               # headroom
    vmem_limit = int(min(vmem_limit_cap, max(need, 16 << 20)))

    kernel = functools.partial(_lm_criterion_kernel, tile_rows=tile_rows,
                               tile_v=tile_v, sub_rows=sub_rows)

    partials = pl.pallas_call(
        kernel,
        out_shape=jax.ShapeDtypeStruct((nr, 1, acc_w), jnp.float32),
        grid_spec=pltpu.PrefetchScalarGridSpec(
            num_scalar_prefetch=0,
            grid=(nr, nv),
            in_specs=[
                pl.BlockSpec((tile_rows, tile_v), lambda i, j: (i, j)),
                pl.BlockSpec((tile_rows, 1), lambda i, j: (i, 0)),
                pl.BlockSpec((tile_rows, 1), lambda i, j: (i, 0)),
            ],
            out_specs=pl.BlockSpec((1, 1, acc_w), lambda i, j: (i, 0, 0)),
            scratch_shapes=[pltpu.VMEM((tile_rows, acc_w), jnp.float32)],
        ),
        compiler_params=pltpu.CompilerParams(
            dimension_semantics=("parallel", "arbitrary"),
            vmem_limit_bytes=vmem_limit,
        ),
    )(inp_f, tgt_f, msk_f)

    # Tiny final reduction + normalization in plain JAX.
    return jnp.sum(partials) / jnp.sum(mask)


if __name__ == "__main__":
    key = jax.random.PRNGKey(0)

    def reference(log_probs, target, mask):
        T = log_probs.shape[1]
        t = target[:, :T]
        m = mask[:, :T].astype(jnp.float32)
        g = jnp.take_along_axis(log_probs.astype(jnp.float32),
                                t[..., None], axis=2)[..., 0]
        return jnp.sum(-g * m) / jnp.sum(m)

    # --- test 1: tiny f32 case, vocab < one lane tile, target/mask truncation
    k1, k2, k3, key = jax.random.split(key, 4)
    B, T, V, T_tgt = 2, 8, 32, 10
    log_probs = jax.nn.log_softmax(jax.random.normal(k1, (B, T, V), jnp.float32), -1)
    target = jax.random.randint(k2, (B, T_tgt), 0, V, dtype=jnp.int32)
    mask = (jax.random.uniform(k3, (B, T_tgt)) > 0.3).astype(jnp.float32)
    mask = mask.at[0, 0].set(1.0)   # guarantee nonzero mask sum
    out = jax.block_until_ready(language_model_criterion(log_probs, target, mask))
    ref = reference(log_probs, target, mask)
    assert jnp.allclose(out, ref, rtol=1e-5, atol=1e-5), (out, ref)

    # --- test 2: bf16 input, explicit tiles -> multi-block grid on both axes
    k1, k2, k3, key = jax.random.split(key, 4)
    B, T, V, T_tgt = 2, 12, 256, 14
    log_probs = jax.nn.log_softmax(
        jax.random.normal(k1, (B, T, V), jnp.float32), -1).astype(jnp.bfloat16)
    target = jax.random.randint(k2, (B, T_tgt), 0, V, dtype=jnp.int32)
    mask = (jax.random.uniform(k3, (B, T_tgt)) > 0.4).astype(jnp.float32)
    mask = mask.at[0, 0].set(1.0)
    out = jax.block_until_ready(
        language_model_criterion(log_probs, target, mask, tile_rows=16, tile_v=128))
    ref = reference(log_probs, target, mask)
    assert jnp.allclose(out, ref, rtol=1e-4, atol=1e-4), (out, ref)

    # --- test 3: auto tiling, bf16, multi-group vocab, ragged row tail
    #     (padded tail rows must be zeroed by the mask guard)
    k1, k2, k3, key = jax.random.split(key, 4)
    B, T, V, T_tgt = 3, 11, 384, 11
    log_probs = jax.nn.log_softmax(
        jax.random.normal(k1, (B, T, V), jnp.float32), -1).astype(jnp.bfloat16)
    target = jax.random.randint(k2, (B, T_tgt), 0, V, dtype=jnp.int32)
    mask = (jax.random.uniform(k3, (B, T_tgt)) > 0.5).astype(jnp.float32)
    mask = mask.at[0, 0].set(1.0)
    out = jax.block_until_ready(language_model_criterion(log_probs, target, mask))
    ref = reference(log_probs, target, mask)
    assert jnp.allclose(out, ref, rtol=1e-4, atol=1e-4), (out, ref)

    print("KERNEL_OK")
</pallas_src>

<mosaic_0001>
module attributes {stable_mosaic.version = 11 : i64} {
  func.func @_lm_criterion_kernel(%arg0: i32, %arg1: i32, %arg2: memref<8x32xf32, #tpu.memory_space<vmem>>, %arg3: memref<8x1xi32, #tpu.memory_space<vmem>>, %arg4: memref<8x1xf32, #tpu.memory_space<vmem>>, %arg5: memref<1x1x1xf32, #tpu.memory_space<vmem>>, %arg6: memref<8x1xf32, #tpu.memory_space<vmem>>) attributes {dimension_semantics = [#tpu.dimension_semantics<parallel>, #tpu.dimension_semantics<arbitrary>], iteration_bounds = array<i64: 2, 1>, scalar_prefetch = 0 : i64, scratch_operands = 1 : i64, tpu.core_type = #tpu.core_type<tc>, window_params = [{transform_indices = @transform_0, window_bounds = array<i64: 8, 32>}, {transform_indices = @transform_1, window_bounds = array<i64: 8, 1>}, {transform_indices = @transform_2, window_bounds = array<i64: 8, 1>}, {transform_indices = @transform_3, window_bounds = array<i64: 1, 1, 1>}]} {
    %c0_i32 = arith.constant 0 : i32
    %0 = arith.cmpi eq, %arg1, %c0_i32 : i32
    %1 = arith.extui %0 : i1 to i32
    %c0_i32_0 = arith.constant 0 : i32
    %2 = arith.cmpi ne, %1, %c0_i32_0 : i32
    scf.if %2 {
      %cst_10 = arith.constant 0.000000e+00 : f32
      %26 = vector.broadcast %cst_10 : f32 to vector<8x1xf32>
      %c0_11 = arith.constant 0 : index
      %c0_12 = arith.constant 0 : index
      %27 = vector.load %arg6[%c0_11, %c0_12] : memref<8x1xf32, #tpu.memory_space<vmem>>, vector<8x1xf32>
      tpu.vector_store %arg6[%c0_11, %c0_12], %26 {strides = array<i32>} : memref<8x1xf32, #tpu.memory_space<vmem>>, vector<8x1xf32>,
    } else {
    }
    %3 = tpu.iota {dimensions = array<i32: 1>} : vector<8x32xi32>
    %c0_i32_1 = arith.constant 0 : i32
    %c1_i32 = arith.constant 1 : i32
    %4 = arith.muli %c0_i32_1, %c1_i32 : i32
    %c0_i32_2 = arith.constant 0 : i32
    %5 = arith.addi %c0_i32_2, %4 : i32
    %c8_i32 = arith.constant 8 : i32
    %6 = arith.muli %5, %c8_i32 : i32
    %7 = tpu.assume_multiple %6, 8 : i32
    %8 = arith.index_cast %7 : i32 to index
    %c0 = arith.constant 0 : index
    %9 = vector.load %arg2[%8, %c0] : memref<8x32xf32, #tpu.memory_space<vmem>>, vector<8x32xf32>
    %10 = arith.index_cast %7 : i32 to index
    %c0_3 = arith.constant 0 : index
    %11 = vector.load %arg3[%10, %c0_3] : memref<8x1xi32, #tpu.memory_space<vmem>>, vector<8x1xi32>
    %12 = vector.broadcast %11 : vector<8x1xi32> to vector<8x32xi32>
    %13 = arith.cmpi eq, %3, %12 : vector<8x32xi32>
    %cst = arith.constant 0.000000e+00 : f32
    %14 = vector.broadcast %cst : f32 to vector<8x32xf32>
    %15 = arith.select %13, %9, %14 : vector<8x32xi1>, vector<8x32xf32>
    %16 = arith.index_cast %7 : i32 to index
    %c0_4 = arith.constant 0 : index
    %17 = vector.load %arg6[%16, %c0_4] : memref<8x1xf32, #tpu.memory_space<vmem>>, vector<8x1xf32>
    %cst_5 = arith.constant dense<0.000000e+00> : vector<8xf32>
    %18 = vector.multi_reduction <add>, %15, %cst_5 [1] : vector<8x32xf32> to vector<8xf32>
    %19 = vector.shape_cast %18 : vector<8xf32> to vector<8x1xf32>
    %20 = arith.addf %17, %19 : vector<8x1xf32>
    %21 = arith.index_cast %7 : i32 to index
    %c0_6 = arith.constant 0 : index
    %22 = vector.load %arg6[%21, %c0_6] : memref<8x1xf32, #tpu.memory_space<vmem>>, vector<8x1xf32>
    tpu.vector_store %arg6[%21, %c0_6], %20 {strides = array<i32>} : memref<8x1xf32, #tpu.memory_space<vmem>>, vector<8x1xf32>,
    %c1_i32_7 = arith.constant 1 : i32
    %c0_i32_8 = arith.constant 0 : i32
    %23 = arith.cmpi eq, %arg1, %c0_i32_8 : i32
    %24 = arith.extui %23 : i1 to i32
    %c0_i32_9 = arith.constant 0 : i32
    %25 = arith.cmpi ne, %24, %c0_i32_9 : i32
    scf.if %25 {
      %c0_10 = arith.constant 0 : index
      %c0_11 = arith.constant 0 : index
      %26 = vector.load %arg4[%c0_10, %c0_11] : memref<8x1xf32, #tpu.memory_space<vmem>>, vector<8x1xf32>
      %cst_12 = arith.constant 0.000000e+00 : f32
      %27 = vector.broadcast %cst_12 : f32 to vector<8x1xf32>
      %28 = arith.cmpf one, %26, %27 : vector<8x1xf32>
      %c0_13 = arith.constant 0 : index
      %c0_14 = arith.constant 0 : index
      %29 = vector.load %arg6[%c0_13, %c0_14] : memref<8x1xf32, #tpu.memory_space<vmem>>, vector<8x1xf32>
      %cst_15 = arith.constant 0.000000e+00 : f32
      %30 = vector.broadcast %cst_15 : f32 to vector<8x1xf32>
      %31 = arith.subf %30, %26 : vector<8x1xf32>
      %32 = arith.mulf %29, %31 : vector<8x1xf32>
      %cst_16 = arith.constant 0.000000e+00 : f32
      %33 = vector.broadcast %cst_16 : f32 to vector<8x1xf32>
      %34 = arith.select %28, %32, %33 : vector<8x1xi1>, vector<8x1xf32>
      %cst_17 = arith.constant dense<0.000000e+00> : vector<1xf32>
      %35 = vector.multi_reduction <add>, %34, %cst_17 [0] : vector<8x1xf32> to vector<1xf32>
      %36 = vector.shape_cast %35 : vector<1xf32> to vector<1x1xf32>
      %c0_18 = arith.constant 0 : index
      %c0_19 = arith.constant 0 : index
      %c0_20 = arith.constant 0 : index
      %37 = vector.load %arg5[%c0_18, %c0_19, %c0_20] : memref<1x1x1xf32, #tpu.memory_space<vmem>>, vector<1x1x1xf32>
      %38 = vector.shape_cast %37 : vector<1x1x1xf32> to vector<1x1xf32>
      %39 = vector.shape_cast %36 : vector<1x1xf32> to vector<1x1x1xf32>
      tpu.vector_store %arg5[%c0_18, %c0_19, %c0_20], %39 {strides = array<i32>} : memref<1x1x1xf32, #tpu.memory_space<vmem>>, vector<1x1x1xf32>,
    } else {
    }
    return
  }
  func.func @transform_0(%arg0: i32, %arg1: i32) -> (i32, i32) {
    %c0_i32 = arith.constant 0 : i32
    return %arg0, %arg1 : i32, i32
  }
  func.func @transform_1(%arg0: i32, %arg1: i32) -> (i32, i32) {
    %c0_i32 = arith.constant 0 : i32
    %c0_i32_0 = arith.constant 0 : i32
    return %arg0, %c0_i32 : i32, i32
  }
  func.func @transform_2(%arg0: i32, %arg1: i32) -> (i32, i32) {
    %c0_i32 = arith.constant 0 : i32
    %c0_i32_0 = arith.constant 0 : i32
    return %arg0, %c0_i32 : i32, i32
  }
  func.func @transform_3(%arg0: i32, %arg1: i32) -> (i32, i32, i32) {
    %c0_i32 = arith.constant 0 : i32
    %c0_i32_0 = arith.constant 0 : i32
    %c0_i32_1 = arith.constant 0 : i32
    return %arg0, %c0_i32, %c0_i32_0 : i32, i32, i32
  }
}

</mosaic_0001>

<bundles_post_ra>
// kernel: language_model_criterion.1
= control target key start
LH: loop header
LB: loop body
LE: loop exit
PB: predicated region body
PF: predicated region fallthrough
CT: control target
= control target key end

     0   :  { %s427_s12 = smov 0   ;;  %s429_s13 = smov 0   ;;  %s473_s0 = inlined_call_operand.vmem [shape: f32[16,32], index: 0, kind: input, shape index: {}]   ;;  %s474_s1 = inlined_call_operand.vmem [shape: s32[16,1], index: 1, kind: input, shape index: {}]   ;;  %s475_s2 = inlined_call_operand.vmem [shape: f32[16,1], index: 2, kind: input, shape index: {}]   ;;  %s476_s3 = inlined_call_operand.vmem [shape: f32[2,1,1], index: 3, kind: output, shape index: {}]  }
   0x1   :  { %s431_s14 = smov 0  }
   0x2 LB: > { %s25_s15 = sadd.s32 1, %s399_s13  ;;  %p348_p0 = scmp.ge.s32.totalorder %s403_s14, 1  ;;  %s403_s14 = sphi %s431_s14, %s13_s14   ;;  %s399_s13 = sphi %s429_s13, %s478_s13   ;;  %s395_s12 = sphi %s427_s12, %s477_s12  }
   0x3   : > { %p27_p1 = scmp.ge.s32.totalorder %s25_s15, 2  ;;  %p171_p2 = scmp.lt.s32.totalorder %s403_s14, 3 }
   0x5   : > { %s480_s15 = smov (%p27_p1, %s25_s15), 0  ;;  %p172_p3 = pnand %p348_p0, %p171_p2 }
   0x6   : > { %p203_p4 = scmp.lt.s32.totalorder (!%p172_p3), %s395_s12, 1 }
   0x7   : > { %175 = sbr.rel (%p172_p3) target bundleno = 277 (0x115), region = 32 }
   0xc   : > { %v405_v0 = vmov 0   ;;  %s482_s12 = smov (!%p203_p4, %s395_s12), 1  ;;  %vm225_vm0 = vcmask 7168   ;;  %v406_v2 = vmov 0.0   ;;  %v227_v3 = vlaneseq }
   0xd   : > { %380 = vset.pattern.permute.xlu0 %v405_v0  ;;  %s349_s16 = sshll.u32 %s482_s12, 3  ;;  %226 = vst.msk [vmem:[#allocation2] sm:$0xff] %vm225_vm0, %v406_v2  ;;  %vm237_vm1 = vcmask 261120   ;;  %s220_s28 = scalar_lea.vmem %s476_s3, %s482_s12  ;;  %vm260_vm4 = vcmask 0  }
   0xe   : > { %s213_s19 = scalar_lea.vmem %s474_s1, %s349_s16  ;;  %s209_s22 = scalar_lea.vmem %s473_s0, %s349_s16  ;;  %v228_v4 = vand.u32 127, %v227_v3 }
   0xf   : > { %v230_v1 = vld [vmem:[%s213_s19] sm:$0xff]  ;;  %s217_s25 = scalar_lea.vmem %s475_s2, %s349_s16 }
  0x10   : > { %232 = vperm.xlu0 %380, %v230_v1   ;;  %v229_v5 = vld [vmem:[%s209_s22] sm:$0xff] }
  0x11   : > { %v247_v12 = vld [vmem:[%s217_s25] sm:$0xff] }
  0x12   : > { %v250_v13 = vsub.f32 0.0, %v247_v12  ;;  %vm248_vm3 = vcmp.ne.f32.partialorder %v247_v12, 0.0 }
  0x14   : > { %v236_v9 = vld [vmem:[#allocation2] sm:$0xff] }
  0x82   : > { %v233_v6 = vpop.permute.xlu0 %232 }
  0x83   : > { %vm234_vm2 = vcmp.eq.s32.totalorder %v228_v4, %v233_v6 }
  0x84   : > { %v235_v7 = vsel %vm234_vm2, %v229_v5, 0.0 }
  0x85   : > { %v238_v8 = vsel %vm237_vm1, %v235_v7, 0.0 }
  0x86   : > { %239 = vadd.xlane.f32.xlu0 %v238_v8 }
  0xf9   : > { %v240_v10 = vpop.xlane.xlu0 %239 }
  0xfa   : > { %v241_v11 = vadd.f32 %v240_v10, %v236_v9 }
  0xfc   : > { %243 = vst.msk [vmem:[#allocation2] sm:$0xff] %vm225_vm0, %v241_v11 }
 0x103   : > { %v249_v14 = vld [vmem:[#allocation2] sm:$0xff] }
 0x104   : > { %v251_v15 = vmul.f32 %v250_v13, %v249_v14 }
 0x106   : > { %v252_v16 = vsel %vm248_vm3, %v251_v15, 0.0 }
 0x107   : > { %v253_v17 = vsel %vm225_vm0, %v252_v16, 0.0 }
 0x108   : > { %v254_v18 = vrot.slane %v253_v17, 4 }
 0x10a   : > { %v255_v19 = vadd.f32 %v254_v18, %v253_v17 }
 0x10c   : > { %v256_v20 = vrot.slane %v255_v19, 2 }
 0x10e   : > { %v257_v21 = vadd.f32 %v256_v20, %v255_v19 }
 0x110   : > { %v258_v22 = vrot.slane %v257_v21, 1 }
 0x112   : > { %v259_v23 = vadd.f32 %v258_v22, %v257_v21 }
 0x114   : > { %261 = vst.msk [vmem:[%s220_s28] sm:$0x1] %vm260_vm4, %v259_v23 }
 0x115 PF: > { %s13_s14 = sadd.s32 1, %s403_s14   ;;  %s477_s12 = smov %s399_s13 }
 0x116   : > { %p10_p5 = scmp.ge.s32.totalorder %s13_s14, 4   ;;  %s478_s13 = smov %s480_s15 }
 0x118   :  { %12 = sbr.rel (!%p10_p5) target bundleno = 2 (0x2), region = 76 }

</bundles_post_ra>
